<compile_context>
chip_gen: v7x
topology: tpu7x:2x2x1
jax: 0.10.0
libtpu: 0.0.40
codegen_flags: <defaults>
</compile_context>

<pallas_src>
import functools

import jax
import jax.numpy as jnp
from jax.experimental import pallas as pl
from jax.experimental.pallas import tpu as pltpu


def _round_up(n, m):
    return ((n + m - 1) // m) * m


def _maybe_pad2d(a, rows, cols):
    r, c = a.shape
    if r == rows and c == cols:
        return a
    return jnp.pad(a, ((0, rows - r), (0, cols - c)))


def _vmem_budget_bytes():
    try:
        cap = int(pltpu.get_tpu_info().vmem_capacity_bytes)
    except Exception:
        cap = 64 * 1024 * 1024          # conservative fallback (v7x per-TensorCore)
    # Leave headroom for compiler-internal scratch / semaphores.
    return min(int(cap * 0.80), cap - 8 * 1024 * 1024)


# ----------------------------- kernels --------------------------------------

def _ffn_resident_kernel(x_ref, w1_ref, b1_ref, w2_ref, b2_ref, o_ref, *, compute_dtype):
    """Weights fully VMEM-resident (constant block index): one pass per M tile."""
    x = x_ref[...].astype(compute_dtype)
    h = jnp.dot(x, w1_ref[...], preferred_element_type=jnp.float32)
    h = jnp.maximum(h + b1_ref[...], 0.0)          # bias + ReLU in f32 (v5e-safe)
    # dropout: identity (eval mode)
    y = jnp.dot(h.astype(compute_dtype), w2_ref[...], preferred_element_type=jnp.float32)
    o_ref[...] = (y + b2_ref[...]).astype(o_ref.dtype)


def _ffn_tiled_kernel(x_ref, w1_ref, b1_ref, w2_ref, b2_ref, o_ref, *, compute_dtype):
    """Hidden dim tiled on innermost ('arbitrary') axis; accumulate into resident f32 o_ref."""
    j = pl.program_id(1)

    @pl.when(j == 0)
    def _():
        # Seed the resident output tile with b2 (no separate epilogue add).
        o_ref[...] = jnp.broadcast_to(b2_ref[...], o_ref.shape).astype(o_ref.dtype)

    x = x_ref[...].astype(compute_dtype)
    h = jnp.dot(x, w1_ref[...], preferred_element_type=jnp.float32)
    h = jnp.maximum(h + b1_ref[...], 0.0)
    # dropout: identity (eval mode)
    o_ref[...] += jnp.dot(h.astype(compute_dtype), w2_ref[...],
                          preferred_element_type=jnp.float32)


# ----------------------------- wrapper ---------------------------------------

@functools.partial(jax.jit, static_argnames=("tile_m", "tile_h", "compute_dtype"))
def positionwise_feed_forward(x, w1, b1, w2, b2, *, tile_m=None, tile_h=None,
                              compute_dtype=jnp.bfloat16):
    """x: (B, T, idim); w1: (idim, hidden); b1: (hidden,); w2: (hidden, idim); b2: (idim,).

    Weights are stored pre-transposed as (in_features, out_features), matching
    PyTorch's  x @ W.T + b  semantics exactly.
    """
    B, T, idim = x.shape
    hidden = w1.shape[1]
    M = B * T

    x_sz = jnp.dtype(x.dtype).itemsize
    csz = jnp.dtype(compute_dtype).itemsize
    budget = _vmem_budget_bytes()

    idim_p = _round_up(idim, 128)                  # lane-dense output tiles
    hidden_full = _round_up(hidden, 128)

    # ---- tile_m: minimize row-padding waste, prefer >=2 blocks on parallel axis
    if tile_m is None:
        cands = [512, 384, 256, 128]
        if budget > 80 * 1024 * 1024 and M >= 2048:
            cands = [1024] + cands

        def keyfn(t):
            mp = _round_up(M, t)
            return (mp - M, 0 if mp // t >= 2 else 1, -t)

        tile_m = min(cands, key=keyfn)
    M_p = _round_up(M, tile_m)

    # ---- VMEM need estimators (double-buffered BlockSpec tiles + intermediates)
    def resident_need(tm):
        return (2 * tm * idim_p * x_sz                    # x tiles
                + 2 * tm * idim_p * x_sz                  # out tiles (x.dtype)
                + 2 * 2 * idim_p * hidden_full * csz      # W1 + W2 (buffered)
                + 4 * (hidden_full + idim_p) * 4          # biases
                + tm * hidden_full * (4 + csz)            # relu intermediate + bf16 cast
                + tm * idim_p * 4)                        # f32 second-matmul result

    def tiled_need(tm, th):
        return (2 * tm * idim_p * x_sz                    # x tiles
                + 2 * tm * idim_p * 4                     # f32 out/accumulator tiles
                + 2 * 2 * idim_p * th * csz               # W1 / W2 slices (buffered)
                + 4 * (th + idim_p) * 4                   # biases
                + tm * th * (4 + csz)                     # relu intermediate + cast
                + tm * idim_p * 4)                        # partial product before +=

    # ---- tile_h: collapse the hidden axis (weight residency) when it fits
    if tile_h is None:
        if resident_need(tile_m) <= budget:
            tile_h = hidden_full
        else:
            chosen = None
            tm_cands = []
            for t in (tile_m, 256, 128):
                if t <= tile_m and t not in tm_cands:
                    tm_cands.append(t)
            for tm in tm_cands:
                for th in (512, 256, 128):
                    if tiled_need(tm, th) <= budget:
                        chosen = (tm, th)
                        break
                if chosen is not None:
                    break
            if chosen is None:
                chosen = (128, 128)                       # last-resort fallback
            tile_m, tile_h = chosen
            M_p = _round_up(M, tile_m)

    hidden_p = _round_up(hidden, tile_h)
    n_m = M_p // tile_m
    n_h = hidden_p // tile_h
    use_resident = (n_h == 1)

    # ---- pad (only when needed) / cast ---------------------------------------
    x2d = _maybe_pad2d(x.reshape(M, idim), M_p, idim_p)           # cast to bf16 in-kernel
    w1p = _maybe_pad2d(w1, idim_p, hidden_p).astype(compute_dtype)
    w2p = _maybe_pad2d(w2, hidden_p, idim_p).astype(compute_dtype)
    b1p = _maybe_pad2d(b1.reshape(1, hidden), 1, hidden_p).astype(jnp.float32)
    b2p = _maybe_pad2d(b2.reshape(1, idim), 1, idim_p).astype(jnp.float32)

    # ---- compiler params / cost ---------------------------------------------
    need = resident_need(tile_m) if use_resident else tiled_need(tile_m, tile_h)
    vmem_limit = int(min(budget, max(int(1.5 * need), 32 * 1024 * 1024)))

    out_bytes = x_sz if use_resident else 4
    w_streams = 1 if use_resident else n_m
    cost = pl.CostEstimate(
        flops=4 * M * idim * hidden,                      # two matmuls
        transcendentals=0,
        bytes_accessed=int(M * idim * x_sz                # x read
                           + M * idim * out_bytes         # output write
                           + 2 * idim * hidden * csz * w_streams
                           + (hidden + idim) * 4),
    )

    if use_resident:
        kernel = functools.partial(_ffn_resident_kernel, compute_dtype=compute_dtype)
        out2d = pl.pallas_call(
            kernel,
            out_shape=jax.ShapeDtypeStruct((M_p, idim_p), x.dtype),
            grid_spec=pltpu.PrefetchScalarGridSpec(
                num_scalar_prefetch=0,
                grid=(n_m,),
                in_specs=[
                    pl.BlockSpec((tile_m, idim_p), lambda i: (i, 0)),     # x rows
                    pl.BlockSpec((idim_p, hidden_p), lambda i: (0, 0)),   # W1 (resident)
                    pl.BlockSpec((1, hidden_p), lambda i: (0, 0)),        # b1
                    pl.BlockSpec((hidden_p, idim_p), lambda i: (0, 0)),   # W2 (resident)
                    pl.BlockSpec((1, idim_p), lambda i: (0, 0)),          # b2
                ],
                out_specs=pl.BlockSpec((tile_m, idim_p), lambda i: (i, 0)),
            ),
            compiler_params=pltpu.CompilerParams(
                dimension_semantics=("parallel",),
                vmem_limit_bytes=vmem_limit,
            ),
            cost_estimate=cost,
        )(x2d, w1p, b1p, w2p, b2p)
    else:
        kernel = functools.partial(_ffn_tiled_kernel, compute_dtype=compute_dtype)
        out2d = pl.pallas_call(
            kernel,
            out_shape=jax.ShapeDtypeStruct((M_p, idim_p), jnp.float32),
            grid_spec=pltpu.PrefetchScalarGridSpec(
                num_scalar_prefetch=0,
                grid=(n_m, n_h),
                in_specs=[
                    pl.BlockSpec((tile_m, idim_p), lambda i, j: (i, 0)),  # x rows
                    pl.BlockSpec((idim_p, tile_h), lambda i, j: (0, j)),  # W1 col slice
                    pl.BlockSpec((1, tile_h), lambda i, j: (0, j)),       # b1 slice
                    pl.BlockSpec((tile_h, idim_p), lambda i, j: (j, 0)),  # W2 row slice
                    pl.BlockSpec((1, idim_p), lambda i, j: (0, 0)),       # b2
                ],
                out_specs=pl.BlockSpec((tile_m, idim_p), lambda i, j: (i, 0)),
            ),
            compiler_params=pltpu.CompilerParams(
                dimension_semantics=("parallel", "arbitrary"),
                vmem_limit_bytes=vmem_limit,
            ),
            cost_estimate=cost,
        )(x2d, w1p, b1p, w2p, b2p)

    return out2d[:M, :idim].reshape(B, T, idim).astype(x.dtype)


if __name__ == "__main__":
    # Small shapes consistent with the module: batch=2, seq=8, idim=32, hidden=64
    B, T, idim, hidden = 2, 8, 32, 64

    key = jax.random.PRNGKey(0)
    kx, kw1, kb1, kw2, kb2 = jax.random.split(key, 5)

    x = jax.random.normal(kx, (B, T, idim), dtype=jnp.float32)
    # Deterministic synthetic parameters (Linear(idim->hidden) and Linear(hidden->idim)),
    # stored pre-transposed as (in, out).
    w1 = jax.random.normal(kw1, (idim, hidden), dtype=jnp.float32) * 0.1
    b1 = jax.random.normal(kb1, (hidden,), dtype=jnp.float32) * 0.1
    w2 = jax.random.normal(kw2, (hidden, idim), dtype=jnp.float32) * 0.1
    b2 = jax.random.normal(kb2, (idim,), dtype=jnp.float32) * 0.1

    out = positionwise_feed_forward(x, w1, b1, w2, b2)
    out = jax.block_until_ready(out)

    # Pure-JAX f32 reference (same semantics as PyTorch eval forward).
    ref = (jnp.maximum(x.reshape(-1, idim) @ w1 + b1, 0.0) @ w2 + b2).reshape(B, T, idim)
    assert out.shape == (B, T, idim)
    # Tolerance accounts for bf16 MXU inputs (f32 accumulation).
    assert jnp.allclose(out, ref, atol=3e-2, rtol=3e-2), "mismatch vs reference"

    print("KERNEL_OK")
</pallas_src>

<mosaic_0001>
module attributes {stable_mosaic.version = 11 : i64} {
  func.func @_ffn_resident_kernel(%arg0: i32, %arg1: memref<128x128xf32, #tpu.memory_space<vmem>>, %arg2: memref<128x128xbf16, #tpu.memory_space<vmem>>, %arg3: memref<1x128xf32, #tpu.memory_space<vmem>>, %arg4: memref<128x128xbf16, #tpu.memory_space<vmem>>, %arg5: memref<1x128xf32, #tpu.memory_space<vmem>>, %arg6: memref<128x128xf32, #tpu.memory_space<vmem>>) attributes {dimension_semantics = [#tpu.dimension_semantics<parallel>], iteration_bounds = array<i64: 1>, scalar_prefetch = 0 : i64, scratch_operands = 0 : i64, tpu.core_type = #tpu.core_type<tc>, window_params = [{transform_indices = @transform_0, window_bounds = array<i64: 128, 128>}, {pipeline_mode = #tpu.pipeline_mode<synchronous>, transform_indices = @transform_1, window_bounds = array<i64: 128, 128>}, {pipeline_mode = #tpu.pipeline_mode<synchronous>, transform_indices = @transform_2, window_bounds = array<i64: 1, 128>}, {pipeline_mode = #tpu.pipeline_mode<synchronous>, transform_indices = @transform_3, window_bounds = array<i64: 128, 128>}, {pipeline_mode = #tpu.pipeline_mode<synchronous>, transform_indices = @transform_4, window_bounds = array<i64: 1, 128>}, {transform_indices = @transform_5, window_bounds = array<i64: 128, 128>}]} {
    %c0 = arith.constant 0 : index
    %c0_0 = arith.constant 0 : index
    %0 = vector.load %arg1[%c0, %c0_0] : memref<128x128xf32, #tpu.memory_space<vmem>>, vector<128x128xf32>
    %1 = arith.truncf %0 : vector<128x128xf32> to vector<128x128xbf16>
    %c0_1 = arith.constant 0 : index
    %c0_2 = arith.constant 0 : index
    %2 = vector.load %arg2[%c0_1, %c0_2] : memref<128x128xbf16, #tpu.memory_space<vmem>>, vector<128x128xbf16>
    %cst = arith.constant dense<0.000000e+00> : vector<128x128xf32>
    %3 = tpu.matmul %1, %2, %cst {dimension_numbers = #tpu.dot_dimension_numbers<[1], [0], [0], [1], [0, 0, 1, 1], [], []>} : vector<128x128xbf16>, vector<128x128xbf16>, vector<128x128xf32> -> vector<128x128xf32>
    %c0_3 = arith.constant 0 : index
    %c0_4 = arith.constant 0 : index
    %4 = vector.load %arg3[%c0_3, %c0_4] : memref<1x128xf32, #tpu.memory_space<vmem>>, vector<1x128xf32>
    %5 = vector.broadcast %4 : vector<1x128xf32> to vector<128x128xf32>
    %6 = arith.addf %3, %5 : vector<128x128xf32>
    %cst_5 = arith.constant 0.000000e+00 : f32
    %7 = vector.broadcast %cst_5 : f32 to vector<128x128xf32>
    %8 = arith.maximumf %6, %7 : vector<128x128xf32>
    %9 = arith.truncf %8 : vector<128x128xf32> to vector<128x128xbf16>
    %c0_6 = arith.constant 0 : index
    %c0_7 = arith.constant 0 : index
    %10 = vector.load %arg4[%c0_6, %c0_7] : memref<128x128xbf16, #tpu.memory_space<vmem>>, vector<128x128xbf16>
    %cst_8 = arith.constant dense<0.000000e+00> : vector<128x128xf32>
    %11 = tpu.matmul %9, %10, %cst_8 {dimension_numbers = #tpu.dot_dimension_numbers<[1], [0], [0], [1], [0, 0, 1, 1], [], []>} : vector<128x128xbf16>, vector<128x128xbf16>, vector<128x128xf32> -> vector<128x128xf32>
    %c0_9 = arith.constant 0 : index
    %c0_10 = arith.constant 0 : index
    %12 = vector.load %arg5[%c0_9, %c0_10] : memref<1x128xf32, #tpu.memory_space<vmem>>, vector<1x128xf32>
    %13 = vector.broadcast %12 : vector<1x128xf32> to vector<128x128xf32>
    %14 = arith.addf %11, %13 : vector<128x128xf32>
    %c0_11 = arith.constant 0 : index
    %c0_12 = arith.constant 0 : index
    %15 = vector.load %arg6[%c0_11, %c0_12] : memref<128x128xf32, #tpu.memory_space<vmem>>, vector<128x128xf32>
    tpu.vector_store %arg6[%c0_11, %c0_12], %14 {strides = array<i32>} : memref<128x128xf32, #tpu.memory_space<vmem>>, vector<128x128xf32>,
    return
  }
  func.func @transform_0(%arg0: i32) -> (i32, i32) {
    %c0_i32 = arith.constant 0 : i32
    %c0_i32_0 = arith.constant 0 : i32
    return %arg0, %c0_i32 : i32, i32
  }
  func.func @transform_1(%arg0: i32) -> (i32, i32) {
    %c0_i32 = arith.constant 0 : i32
    %c0_i32_0 = arith.constant 0 : i32
    %c0_i32_1 = arith.constant 0 : i32
    return %c0_i32, %c0_i32_0 : i32, i32
  }
  func.func @transform_2(%arg0: i32) -> (i32, i32) {
    %c0_i32 = arith.constant 0 : i32
    %c0_i32_0 = arith.constant 0 : i32
    %c0_i32_1 = arith.constant 0 : i32
    return %c0_i32, %c0_i32_0 : i32, i32
  }
  func.func @transform_3(%arg0: i32) -> (i32, i32) {
    %c0_i32 = arith.constant 0 : i32
    %c0_i32_0 = arith.constant 0 : i32
    %c0_i32_1 = arith.constant 0 : i32
    return %c0_i32, %c0_i32_0 : i32, i32
  }
  func.func @transform_4(%arg0: i32) -> (i32, i32) {
    %c0_i32 = arith.constant 0 : i32
    %c0_i32_0 = arith.constant 0 : i32
    %c0_i32_1 = arith.constant 0 : i32
    return %c0_i32, %c0_i32_0 : i32, i32
  }
  func.func @transform_5(%arg0: i32) -> (i32, i32) {
    %c0_i32 = arith.constant 0 : i32
    %c0_i32_0 = arith.constant 0 : i32
    return %arg0, %c0_i32 : i32, i32
  }
}

</mosaic_0001>

<bundles_post_ra>
// kernel: positionwise_feed_forward.1
= control target key start
LH: loop header
LB: loop body
LE: loop exit
PB: predicated region body
PF: predicated region fallthrough
CT: control target
= control target key end

     0   :  { %s735_s1 = inlined_call_operand.vmem [shape: bf16[128,128], index: 1, kind: input, shape index: {}]   ;;  %s736_s0 = inlined_call_operand.vmem [shape: f32[128,128], index: 0, kind: input, shape index: {}]   ;;  %s737_s3 = inlined_call_operand.vmem [shape: bf16[128,128], index: 3, kind: input, shape index: {}]   ;;  %s738_s2 = inlined_call_operand.vmem [shape: f32[1,128], index: 2, kind: input, shape index: {}]   ;;  %s739_s4 = inlined_call_operand.vmem [shape: f32[1,128], index: 4, kind: input, shape index: {}]   ;;  %s740_s5 = inlined_call_operand.vmem [shape: f32[128,128], index: 5, kind: output, shape index: {}]  }
   0x1   :  { %v539_v0 = vld [vmem:[%s735_s1] sm:$0xff]   ;;  %v540_v1 = vld [vmem:[%s735_s1 + $0x8] sm:$0xff]   ;;  %v541_v2 = vld [vmem:[%s735_s1 + $0x10] sm:$0xff]  }
   0x2   :  { %475 = vmatprep.subr.bf16.mxu0 %v539_v0  ;;  %v542_v3 = vld [vmem:[%s735_s1 + $0x18] sm:$0xff]   ;;  %v21_v4 = vld [vmem:[%s736_s0] sm:$0xff]  ;;  %v22_v5 = vld [vmem:[%s736_s0 + $0x8] sm:$0xff] }
   0x3   :  { %476 = vmatpush3.bf16.msra.mxu0 %v539_v0  ;;  %v37_v6 = vpack.c.bf16 %v22_v5, %v21_v4  ;;  %v543_v7 = vld [vmem:[%s735_s1 + $0x20] sm:$0xff]   ;;  %v548_v9 = vld [vmem:[%s737_s3 + $0x8] sm:$0xff]   ;;  %v549_v11 = vld [vmem:[%s737_s3 + $0x10] sm:$0xff]  }
   0x4   :  { %477 = vmatprep.subr.bf16.mxu0 %v540_v1  ;;  %v547_v8 = vld [vmem:[%s737_s3] sm:$0xff]   ;;  %v544_v10 = vld [vmem:[%s735_s1 + $0x28] sm:$0xff]   ;;  %v545_v12 = vld [vmem:[%s735_s1 + $0x30] sm:$0xff]  }
   0x5   :  { %491 = vmatprep.mubr.bf16.mxu0 %v37_v6  ;;  %507 = vmatprep.subr.bf16.mxu1 %v547_v8  ;;  %v550_v13 = vld [vmem:[%s737_s3 + $0x18] sm:$0xff]   ;;  %v551_v15 = vld [vmem:[%s737_s3 + $0x20] sm:$0xff]   ;;  %v23_v16 = vld [vmem:[%s736_s0 + $0x10] sm:$0xff] }
   0x6   :  { %508 = vmatpush3.bf16.msra.mxu1 %v547_v8  ;;  %v546_v14 = vld [vmem:[%s735_s1 + $0x38] sm:$0xff]   ;;  %v25_v18 = vld [vmem:[%s736_s0 + $0x20] sm:$0xff]  ;;  %v26_v19 = vld [vmem:[%s736_s0 + $0x28] sm:$0xff] }
   0x7   :  { %478 = vmatpush3.bf16.msra.mxu0 %v540_v1  ;;  %509 = vmatprep.subr.bf16.mxu1 %v548_v9  ;;  %v24_v17 = vld [vmem:[%s736_s0 + $0x18] sm:$0xff]  ;;  %v552_v21 = vld [vmem:[%s737_s3 + $0x28] sm:$0xff]   ;;  %v39_v22 = vpack.c.bf16 %v26_v19, %v25_v18  ;;  %v27_v23 = vld [vmem:[%s736_s0 + $0x30] sm:$0xff] }
   0x8   :  { %479 = vmatprep.subr.bf16.mxu0 %v541_v2  ;;  %v38_v20 = vpack.c.bf16 %v24_v17, %v23_v16  ;;  %v28_v24 = vld [vmem:[%s736_s0 + $0x38] sm:$0xff]  ;;  %v29_v25 = vld [vmem:[%s736_s0 + $0x40] sm:$0xff]  ;;  %v30_v26 = vld [vmem:[%s736_s0 + $0x48] sm:$0xff] }
   0x9   :  { %v40_v27 = vpack.c.bf16 %v28_v24, %v27_v23  ;;  %v41_v28 = vpack.c.bf16 %v30_v26, %v29_v25  ;;  %v31_v29 = vld [vmem:[%s736_s0 + $0x50] sm:$0xff]  ;;  %v32_v30 = vld [vmem:[%s736_s0 + $0x58] sm:$0xff]  ;;  %v33_v31 = vld [vmem:[%s736_s0 + $0x60] sm:$0xff] }
   0xa   :  { %510 = vmatpush3.bf16.msra.mxu1 %v548_v9  ;;  %v34_v32 = vld [vmem:[%s736_s0 + $0x68] sm:$0xff]  ;;  %v42_v33 = vpack.c.bf16 %v32_v30, %v31_v29  ;;  %v35_v35 = vld [vmem:[%s736_s0 + $0x70] sm:$0xff]  ;;  %v36_v36 = vld [vmem:[%s736_s0 + $0x78] sm:$0xff] }
   0xb   :  { %480 = vmatpush3.bf16.msra.mxu0 %v541_v2  ;;  %511 = vmatprep.subr.bf16.mxu1 %v549_v11  ;;  %v43_v34 = vpack.c.bf16 %v34_v32, %v33_v31  ;;  %v44_v37 = vpack.c.bf16 %v36_v36, %v35_v35  ;;  %v553_v38 = vld [vmem:[%s737_s3 + $0x30] sm:$0xff]   ;;  %v554_v39 = vld [vmem:[%s737_s3 + $0x38] sm:$0xff]   ;;  %v425_v40 = vld [vmem:[%s738_s2] ss:$0 sm:$0xff] }
   0xc   :  { %481 = vmatprep.subr.bf16.mxu0 %v542_v3 }
   0xe   :  { %512 = vmatpush3.bf16.msra.mxu1 %v549_v11 }
   0xf   :  { %482 = vmatpush3.bf16.msra.mxu0 %v542_v3  ;;  %513 = vmatprep.subr.bf16.mxu1 %v550_v13 }
  0x10   :  { %483 = vmatprep.subr.bf16.mxu0 %v543_v7 }
  0x12   :  { %514 = vmatpush3.bf16.msra.mxu1 %v550_v13 }
  0x13   :  { %484 = vmatpush3.bf16.msra.mxu0 %v543_v7  ;;  %515 = vmatprep.subr.bf16.mxu1 %v551_v15 }
  0x14   :  { %485 = vmatprep.subr.bf16.mxu0 %v544_v10 }
  0x16   :  { %516 = vmatpush3.bf16.msra.mxu1 %v551_v15 }
  0x17   :  { %486 = vmatpush3.bf16.msra.mxu0 %v544_v10  ;;  %517 = vmatprep.subr.bf16.mxu1 %v552_v21 }
  0x18   :  { %487 = vmatprep.subr.bf16.mxu0 %v545_v12 }
  0x1a   :  { %518 = vmatpush3.bf16.msra.mxu1 %v552_v21 }
  0x1b   :  { %488 = vmatpush3.bf16.msra.mxu0 %v545_v12  ;;  %519 = vmatprep.subr.bf16.mxu1 %v553_v38 }
  0x1c   :  { %489 = vmatprep.subr.bf16.mxu0 %v546_v14 }
  0x1e   :  { %520 = vmatpush3.bf16.msra.mxu1 %v553_v38 }
  0x1f   :  { %490 = vmatpush3.bf16.msra.mxu0 %v546_v14  ;;  %521 = vmatprep.subr.bf16.mxu1 %v554_v39 }
  0x22   :  { %492 = vmatmul.mubr.bf16.vlgmr.msra.gmra.mrb[0].mxu0 %v38_v20  ;;  %522 = vmatpush3.bf16.msra.mxu1 %v554_v39 }
  0x23   :  { %495 = vmatprep.mubr.bf16.mxu0 %v39_v22 }
  0x2a   :  { %496 = vmatmul.mubr.bf16.gmra.mrb[4].mxu0 %v40_v27 }
  0x2b   :  { %499 = vmatprep.mubr.bf16.mxu0 %v41_v28 }
  0x32   :  { %500 = vmatmul.mubr.bf16.gmra.mrb[8].mxu0 %v42_v33  ;;  %v434_v33 = vld [vmem:[%s739_s4] ss:$0 sm:$0xff] }
  0x33   :  { %503 = vmatprep.mubr.bf16.mxu0 %v43_v34 }
  0x3a   :  { %504 = vmatmul.mubr.bf16.gmra.mrb[12].mxu0 %v44_v37 }
  0xf5   :  { %v493_v41 = vpop.f32.mrb[0].mxu0 }
  0xf6   :  { %v159_v42 = vadd.f32 %v493_v41, %v425_v40  ;;  %v150_v43 = vpop.f32.mrb[1].mxu0 }
  0xf7   :  { %v151_v44 = vadd.f32 %v425_v40, %v150_v43  ;;  %v494_v45 = vpop.f32.mrb[2].mxu0 }
  0xf8   :  { %v162_v46 = vadd.f32 %v494_v45, %v425_v40  ;;  %v153_v47 = vpop.f32.mrb[3].mxu0  ;;  %v215_v49 = vmax.f32 %v159_v42, 0.0 }
  0xf9   :  { %v154_v48 = vadd.f32 %v425_v40, %v153_v47  ;;  %v213_v51 = vmax.f32 %v151_v44, 0.0 }
  0xfa   :  { %v216_v50 = vmax.f32 %v162_v46, 0.0 }
  0xfb   :  { %v214_v52 = vmax.f32 %v154_v48, 0.0 }
  0xfc   :  { %v230_v53 = vpack.c.bf16 %v216_v50, %v215_v49 }
  0xfd   :  { %v497_v54 = vpop.f32.mrb[4].mxu0  ;;  %v229_v55 = vpack.c.bf16 %v214_v52, %v213_v51 }
  0xfe   :  { %v175_v56 = vadd.f32 %v497_v54, %v425_v40  ;;  %v166_v57 = vpop.f32.mrb[5].mxu0 }
  0xff   :  { %v167_v58 = vadd.f32 %v425_v40, %v166_v57  ;;  %v498_v59 = vpop.f32.mrb[6].mxu0  ;;  %523 = vmatprep.mubr.bf16.mxu1 %v229_v55 }
 0x100   :  { %v178_v60 = vadd.f32 %v498_v59, %v425_v40  ;;  %v169_v61 = vpop.f32.mrb[7].mxu0  ;;  %524 = vmatmul.mubr.bf16.vlgmr.msra.gmra.mrb[0].mxu1 %v230_v53  ;;  %v219_v63 = vmax.f32 %v175_v56, 0.0 }
 0x101   :  { %v170_v62 = vadd.f32 %v425_v40, %v169_v61  ;;  %v217_v1 = vmax.f32 %v167_v58, 0.0 }
 0x102   :  { %v220_v0 = vmax.f32 %v178_v60, 0.0 }
 0x103   :  { %v218_v2 = vmax.f32 %v170_v62, 0.0 }
 0x104   :  { %v232_v3 = vpack.c.bf16 %v220_v0, %v219_v63 }
 0x105   :  { %v231_v4 = vpack.c.bf16 %v218_v2, %v217_v1  ;;  %v501_v5 = vpop.f32.mrb[8].mxu0 }
 0x106   :  { %v191_v6 = vadd.f32 %v501_v5, %v425_v40  ;;  %v182_v7 = vpop.f32.mrb[9].mxu0 }
 0x107   :  { %v183_v8 = vadd.f32 %v425_v40, %v182_v7  ;;  %v502_v9 = vpop.f32.mrb[10].mxu0  ;;  %527 = vmatprep.mubr.bf16.mxu1 %v231_v4 }
 0x108   :  { %v194_v10 = vadd.f32 %v502_v9, %v425_v40  ;;  %v185_v11 = vpop.f32.mrb[11].mxu0  ;;  %528 = vmatmul.mubr.bf16.gmra.mrb[4].mxu1 %v232_v3  ;;  %v223_v13 = vmax.f32 %v191_v6, 0.0 }
 0x109   :  { %v186_v12 = vadd.f32 %v425_v40, %v185_v11  ;;  %v221_v15 = vmax.f32 %v183_v8, 0.0 }
 0x10a   :  { %v224_v14 = vmax.f32 %v194_v10, 0.0 }
 0x10b   :  { %v222_v16 = vmax.f32 %v186_v12, 0.0 }
 0x10c   :  { %v234_v17 = vpack.c.bf16 %v224_v14, %v223_v13 }
 0x10d   :  { %v233_v18 = vpack.c.bf16 %v222_v16, %v221_v15  ;;  %v505_v19 = vpop.f32.mrb[12].mxu0 }
 0x10e   :  { %v207_v20 = vadd.f32 %v505_v19, %v425_v40  ;;  %v198_v21 = vpop.f32.mrb[13].mxu0 }
 0x10f   :  { %v199_v22 = vadd.f32 %v425_v40, %v198_v21  ;;  %v506_v23 = vpop.f32.mrb[14].mxu0  ;;  %531 = vmatprep.mubr.bf16.mxu1 %v233_v18 }
 0x110   :  { %v210_v24 = vadd.f32 %v506_v23, %v425_v40  ;;  %v201_v25 = vpop.f32.mrb[15].mxu0  ;;  %532 = vmatmul.mubr.bf16.gmra.mrb[8].mxu1 %v234_v17  ;;  %v227_v27 = vmax.f32 %v207_v20, 0.0 }
 0x111   :  { %v202_v26 = vadd.f32 %v425_v40, %v201_v25  ;;  %v225_v29 = vmax.f32 %v199_v22, 0.0 }
 0x112   :  { %v228_v28 = vmax.f32 %v210_v24, 0.0 }
 0x113   :  { %v226_v30 = vmax.f32 %v202_v26, 0.0 }
 0x114   :  { %v236_v31 = vpack.c.bf16 %v228_v28, %v227_v27 }
 0x115   :  { %v235_v32 = vpack.c.bf16 %v226_v30, %v225_v29 }
 0x117   :  { %535 = vmatprep.mubr.bf16.mxu1 %v235_v32 }
 0x118   :  { %536 = vmatmul.mubr.bf16.gmra.mrb[12].mxu1 %v236_v31 }
 0x1d3   :  { %v525_v34 = vpop.f32.mrb[0].mxu1 }
 0x1d4   :  { %v351_v35 = vadd.f32 %v525_v34, %v434_v33  ;;  %v342_v36 = vpop.f32.mrb[1].mxu1 }
 0x1d5   :  { %v343_v37 = vadd.f32 %v434_v33, %v342_v36  ;;  %v526_v38 = vpop.f32.mrb[2].mxu1 }
 0x1d6   :  { %407 = vst [vmem:[%s740_s5 + $0x10] sm:$0xff] %v351_v35  ;;  %v354_v39 = vadd.f32 %v526_v38, %v434_v33  ;;  %v345_v40 = vpop.f32.mrb[3].mxu1 }
 0x1d7   :  { %405 = vst [vmem:[%s740_s5] sm:$0xff] %v343_v37  ;;  %v346_v41 = vadd.f32 %v434_v33, %v345_v40 }
 0x1d8   :  { %408 = vst [vmem:[%s740_s5 + $0x18] sm:$0xff] %v354_v39 }
 0x1d9   :  { %406 = vst [vmem:[%s740_s5 + $0x8] sm:$0xff] %v346_v41 }
 0x1db   :  { %v529_v42 = vpop.f32.mrb[4].mxu1 }
 0x1dc   :  { %v367_v43 = vadd.f32 %v529_v42, %v434_v33  ;;  %v358_v44 = vpop.f32.mrb[5].mxu1 }
 0x1dd   :  { %v359_v45 = vadd.f32 %v434_v33, %v358_v44  ;;  %v530_v46 = vpop.f32.mrb[6].mxu1 }
 0x1de   :  { %411 = vst [vmem:[%s740_s5 + $0x30] sm:$0xff] %v367_v43  ;;  %v370_v47 = vadd.f32 %v530_v46, %v434_v33  ;;  %v361_v48 = vpop.f32.mrb[7].mxu1 }
 0x1df   :  { %409 = vst [vmem:[%s740_s5 + $0x20] sm:$0xff] %v359_v45  ;;  %v362_v49 = vadd.f32 %v434_v33, %v361_v48 }
 0x1e0   :  { %412 = vst [vmem:[%s740_s5 + $0x38] sm:$0xff] %v370_v47 }
 0x1e1   :  { %410 = vst [vmem:[%s740_s5 + $0x28] sm:$0xff] %v362_v49 }
 0x1e3   :  { %v533_v50 = vpop.f32.mrb[8].mxu1 }
 0x1e4   :  { %v383_v51 = vadd.f32 %v533_v50, %v434_v33  ;;  %v374_v52 = vpop.f32.mrb[9].mxu1 }
 0x1e5   :  { %v375_v53 = vadd.f32 %v434_v33, %v374_v52  ;;  %v534_v54 = vpop.f32.mrb[10].mxu1 }
 0x1e6   :  { %415 = vst [vmem:[%s740_s5 + $0x50] sm:$0xff] %v383_v51  ;;  %v386_v55 = vadd.f32 %v534_v54, %v434_v33  ;;  %v377_v56 = vpop.f32.mrb[11].mxu1 }
 0x1e7   :  { %413 = vst [vmem:[%s740_s5 + $0x40] sm:$0xff] %v375_v53  ;;  %v378_v57 = vadd.f32 %v434_v33, %v377_v56 }
 0x1e8   :  { %416 = vst [vmem:[%s740_s5 + $0x58] sm:$0xff] %v386_v55 }
 0x1e9   :  { %414 = vst [vmem:[%s740_s5 + $0x48] sm:$0xff] %v378_v57 }
 0x1eb   :  { %v537_v58 = vpop.f32.mrb[12].mxu1 }
 0x1ec   :  { %v399_v59 = vadd.f32 %v537_v58, %v434_v33  ;;  %v390_v60 = vpop.f32.mrb[13].mxu1 }
 0x1ed   :  { %v391_v61 = vadd.f32 %v434_v33, %v390_v60  ;;  %v538_v62 = vpop.f32.mrb[14].mxu1 }
 0x1ee   :  { %419 = vst [vmem:[%s740_s5 + $0x70] sm:$0xff] %v399_v59  ;;  %v402_v63 = vadd.f32 %v538_v62, %v434_v33  ;;  %v393_v0 = vpop.f32.mrb[15].mxu1 }
 0x1ef   :  { %417 = vst [vmem:[%s740_s5 + $0x60] sm:$0xff] %v391_v61  ;;  %v394_v1 = vadd.f32 %v434_v33, %v393_v0 }
 0x1f0   :  { %420 = vst [vmem:[%s740_s5 + $0x78] sm:$0xff] %v402_v63 }
 0x1f1   :  { %418 = vst [vmem:[%s740_s5 + $0x68] sm:$0xff] %v394_v1 }

</bundles_post_ra>
